<compile_context>
chip_gen: v7x
topology: tpu7x:2x2x1
jax: 0.10.0
libtpu: 0.0.40
codegen_flags: <defaults>
</compile_context>

<pallas_src>
import math
import functools

import jax
import jax.numpy as jnp
from jax import lax
from jax.experimental import pallas as pl
from jax.experimental.pallas import tpu as pltpu

_VMEM_LIMIT = 48 * 1024 * 1024  # safe on v5e/v6e (128 MiB) and v7x (64 MiB)


# ---------------------------------------------------------------------------
# Kernel 1: Conv1D (x @ W + b) — used for c_attn (E -> 3E) and c_proj (E -> E)
# Tiled over rows (M) and output columns (N).  K stays whole inside a block
# (GPT2-sized K fits easily), so no accumulator / K-axis is needed and both
# grid axes are "parallel" (megacore-shardable).
# ---------------------------------------------------------------------------
def _linear_kernel(x_ref, w_ref, b_ref, o_ref):
    acc = jnp.dot(x_ref[...], w_ref[...], preferred_element_type=jnp.float32)
    o_ref[...] = (acc + b_ref[...]).astype(o_ref.dtype)


def _pick_tile(dim, preferred):
    # Use the preferred tile only if it divides evenly; otherwise fall back to
    # full extent (always a legal block size for the last two dims).
    if dim <= preferred or dim % preferred != 0:
        return dim
    return preferred


def conv1d(x2d, w, b, *, out_dtype, tm=256, tn=512):
    """x2d: (M, K), w: (K, N), b: (N,) f32 -> (M, N) in out_dtype."""
    M, K = x2d.shape
    _, N = w.shape
    tm = _pick_tile(M, tm)
    tn = _pick_tile(N, tn)
    return pl.pallas_call(
        _linear_kernel,
        out_shape=jax.ShapeDtypeStruct((M, N), out_dtype),
        grid=(M // tm, N // tn),
        in_specs=[
            pl.BlockSpec((tm, K), lambda i, j: (i, 0)),
            pl.BlockSpec((K, tn), lambda i, j: (0, j)),
            pl.BlockSpec((1, tn), lambda i, j: (0, j)),
        ],
        out_specs=pl.BlockSpec((tm, tn), lambda i, j: (i, j)),
        compiler_params=pltpu.CompilerParams(
            dimension_semantics=("parallel", "parallel"),
            vmem_limit_bytes=_VMEM_LIMIT,
        ),
    )(x2d, w, b.reshape(1, N))


# ---------------------------------------------------------------------------
# Kernel 2: eager causal attention — all heads for one batch element per step
# ---------------------------------------------------------------------------
def _attention_body(qkv, o_ref, w_ref, *, num_heads, head_dim, embed_dim):
    T = qkv.shape[0]

    # Causal mask hoisted out of the per-head loop (computed once per step).
    row = lax.broadcasted_iota(jnp.int32, (T, T), 0)
    col = lax.broadcasted_iota(jnp.int32, (T, T), 1)
    causal = row >= col
    mask_value = jnp.float32(jnp.finfo(jnp.float32).min)
    inv_scale = 1.0 / math.sqrt(head_dim)   # weak python float: keeps q dtype

    head_outs = []
    for h in range(num_heads):               # static, fully-unrolled head loop
        q = qkv[:, h * head_dim:(h + 1) * head_dim]
        k = qkv[:, embed_dim + h * head_dim: embed_dim + (h + 1) * head_dim]
        v = qkv[:, 2 * embed_dim + h * head_dim:
                   2 * embed_dim + (h + 1) * head_dim]

        # Fold 1/sqrt(Dh) into q (T*Dh mults instead of T*T).
        qs = q * inv_scale
        # q @ k^T without materializing a transposed copy of k.
        s = lax.dot_general(qs, k, (((1,), (1,)), ((), ())),
                            preferred_element_type=jnp.float32)
        s = jnp.where(causal, s, mask_value)

        # softmax over the key axis, in f32 (matches the torch reference;
        # attn_dropout is identity in eval, no head_mask).
        m = jnp.max(s, axis=-1, keepdims=True)
        e = jnp.exp(s - m)
        p = e / jnp.sum(e, axis=-1, keepdims=True)

        if w_ref is not None:
            w_ref[0, h] = p
        head_outs.append(
            jnp.dot(p.astype(v.dtype), v, preferred_element_type=jnp.float32))

    # Single lane-dense (T, E) store with heads already merged — this is the
    # (B, T, E) layout c_proj consumes, so no wrapper-side transpose.
    o_ref[0] = jnp.concatenate(head_outs, axis=-1).astype(o_ref.dtype)


def _attn_kernel_with_weights(qkv_ref, o_ref, w_ref, **kw):
    _attention_body(qkv_ref[0], o_ref, w_ref, **kw)


def _attn_kernel_no_weights(qkv_ref, o_ref, **kw):
    _attention_body(qkv_ref[0], o_ref, None, **kw)


def fused_heads_attention(qkv, num_heads, *, output_attentions, out_dtype):
    """qkv: (B, T, 3E) -> attn_out (B, T, E) [+ attn_weights (B, H, T, T) f32]."""
    # TODO(synk): for very long T (>=1024, esp. v7x 64 MiB VMEM) add a key-axis
    # grid dim with flash-style online softmax instead of a resident (T,T) tile.
    B, T, threeE = qkv.shape
    E = threeE // 3
    Dh = E // num_heads
    kw = dict(num_heads=num_heads, head_dim=Dh, embed_dim=E)

    in_specs = [pl.BlockSpec((1, T, threeE), lambda b: (b, 0, 0))]
    o_spec = pl.BlockSpec((1, T, E), lambda b: (b, 0, 0))

    if output_attentions:
        kernel = functools.partial(_attn_kernel_with_weights, **kw)
        out_shape = (
            jax.ShapeDtypeStruct((B, T, E), out_dtype),
            jax.ShapeDtypeStruct((B, num_heads, T, T), jnp.float32),
        )
        out_specs = (o_spec,
                     pl.BlockSpec((1, num_heads, T, T), lambda b: (b, 0, 0, 0)))
    else:
        kernel = functools.partial(_attn_kernel_no_weights, **kw)
        out_shape = jax.ShapeDtypeStruct((B, T, E), out_dtype)
        out_specs = o_spec

    return pl.pallas_call(
        kernel,
        out_shape=out_shape,
        grid=(B,),
        in_specs=in_specs,
        out_specs=out_specs,
        compiler_params=pltpu.CompilerParams(
            dimension_semantics=("parallel",),
            vmem_limit_bytes=_VMEM_LIMIT,
        ),
    )(qkv)


# ---------------------------------------------------------------------------
# Module wrapper
# ---------------------------------------------------------------------------
def decision_transformer_gpt2_attention(hidden_states, params, num_heads, *,
                                        output_attentions=True,
                                        compute_dtype=jnp.float32):
    """hidden_states: (B, T, E).  Returns (attn_output f32, attn_weights|None)."""
    B, T, E = hidden_states.shape
    cd = compute_dtype

    # c_attn: (B*T, E) @ (E, 3E) + b, stored in compute dtype (halves HBM/DMA
    # traffic of the qkv intermediate when cd == bf16).
    x2d = hidden_states.reshape(B * T, E).astype(cd)
    qkv = conv1d(x2d,
                 params["c_attn_w"].astype(cd),
                 params["c_attn_b"].astype(jnp.float32),
                 out_dtype=cd).reshape(B, T, 3 * E)

    # Fused per-batch all-heads attention. Head split happens via static
    # column slices of the VMEM block — no HBM-side to_heads/transposes.
    if output_attentions:
        attn_out, attn_w = fused_heads_attention(
            qkv, num_heads, output_attentions=True, out_dtype=cd)
    else:
        attn_out = fused_heads_attention(
            qkv, num_heads, output_attentions=False, out_dtype=cd)
        attn_w = None

    # c_proj; resid_dropout is identity in eval.
    out = conv1d(attn_out.reshape(B * T, E),
                 params["c_proj_w"].astype(cd),
                 params["c_proj_b"].astype(jnp.float32),
                 out_dtype=jnp.float32).reshape(B, T, E)
    return out, attn_w


# ---------------------------------------------------------------------------
# Pure-JAX reference (mirrors eager_attention_forward) for verification
# ---------------------------------------------------------------------------
def reference(hidden_states, params, num_heads):
    B, T, E = hidden_states.shape
    H = num_heads
    Dh = E // H
    qkv = hidden_states.reshape(B * T, E) @ params["c_attn_w"] + params["c_attn_b"]
    q, k, v = jnp.split(qkv, 3, axis=-1)

    def to_heads(x):
        return x.reshape(B, T, H, Dh).transpose(0, 2, 1, 3)

    q, k, v = to_heads(q), to_heads(k), to_heads(v)
    s = jnp.einsum("bhqd,bhkd->bhqk", q, k) / math.sqrt(Dh)
    causal = jnp.tril(jnp.ones((T, T), dtype=bool))
    s = jnp.where(causal[None, None], s, jnp.finfo(jnp.float32).min)
    p = jax.nn.softmax(s, axis=-1)
    o = jnp.einsum("bhqk,bhkd->bhqd", p, v)
    o = o.transpose(0, 2, 1, 3).reshape(B * T, E)
    out = (o @ params["c_proj_w"] + params["c_proj_b"]).reshape(B, T, E)
    return out, p


if __name__ == "__main__":
    # Small config consistent with the module: hidden_size=32, heads=4, seq=8
    B, T, E, H = 2, 8, 32, 4

    key = jax.random.PRNGKey(0)
    k1, k2, k3, k4, k5 = jax.random.split(key, 5)

    # Conv1D params: weight (in, out), bias (out,)
    params = {
        "c_attn_w": jax.random.normal(k1, (E, 3 * E), jnp.float32) * 0.02,
        "c_attn_b": jax.random.normal(k2, (3 * E,), jnp.float32) * 0.02,
        "c_proj_w": jax.random.normal(k3, (E, E), jnp.float32) * 0.02,
        "c_proj_b": jax.random.normal(k4, (E,), jnp.float32) * 0.02,
    }
    hidden_states = jax.random.normal(k5, (B, T, E), jnp.float32)

    ref_out, ref_w = reference(hidden_states, params, H)

    # f32 path: strict check against the reference.
    out, attn_w = decision_transformer_gpt2_attention(
        hidden_states, params, H, output_attentions=True,
        compute_dtype=jnp.float32)
    out = jax.block_until_ready(out)
    attn_w = jax.block_until_ready(attn_w)
    assert out.shape == (B, T, E) and attn_w.shape == (B, H, T, T)
    assert jnp.allclose(out, ref_out, atol=1e-5, rtol=1e-5)
    assert jnp.allclose(attn_w, ref_w, atol=1e-5, rtol=1e-5)

    # output_attentions=False fast path (skips the (B,H,T,T) HBM writeback).
    out_no_w, none_w = decision_transformer_gpt2_attention(
        hidden_states, params, H, output_attentions=False,
        compute_dtype=jnp.float32)
    out_no_w = jax.block_until_ready(out_no_w)
    assert none_w is None
    assert jnp.allclose(out_no_w, ref_out, atol=1e-5, rtol=1e-5)

    # bf16 MXU path (v6e/v7x); softmax/accumulation stay f32, loose tolerance.
    out_bf16, _ = decision_transformer_gpt2_attention(
        hidden_states, params, H, output_attentions=True,
        compute_dtype=jnp.bfloat16)
    out_bf16 = jax.block_until_ready(out_bf16)
    assert jnp.allclose(out_bf16.astype(jnp.float32), ref_out,
                        atol=5e-2, rtol=5e-2)

    print("KERNEL_OK")
</pallas_src>

<mosaic_0001>
module attributes {stable_mosaic.version = 11 : i64} {
  func.func @_linear_kernel(%arg0: i32, %arg1: i32, %arg2: memref<16x32xf32, #tpu.memory_space<vmem>>, %arg3: memref<32x96xf32, #tpu.memory_space<vmem>>, %arg4: memref<1x96xf32, #tpu.memory_space<vmem>>, %arg5: memref<16x96xf32, #tpu.memory_space<vmem>>) attributes {dimension_semantics = [#tpu.dimension_semantics<parallel>, #tpu.dimension_semantics<parallel>], iteration_bounds = array<i64: 1, 1>, scalar_prefetch = 0 : i64, scratch_operands = 0 : i64, tpu.core_type = #tpu.core_type<tc>, window_params = [{transform_indices = @transform_0, window_bounds = array<i64: 16, 32>}, {transform_indices = @transform_1, window_bounds = array<i64: 32, 96>}, {transform_indices = @transform_2, window_bounds = array<i64: 1, 96>}, {transform_indices = @transform_3, window_bounds = array<i64: 16, 96>}]} {
    %c0 = arith.constant 0 : index
    %c0_0 = arith.constant 0 : index
    %0 = vector.load %arg2[%c0, %c0_0] : memref<16x32xf32, #tpu.memory_space<vmem>>, vector<16x32xf32>
    %c0_1 = arith.constant 0 : index
    %c0_2 = arith.constant 0 : index
    %1 = vector.load %arg3[%c0_1, %c0_2] : memref<32x96xf32, #tpu.memory_space<vmem>>, vector<32x96xf32>
    %cst = arith.constant dense<0.000000e+00> : vector<16x96xf32>
    %2 = tpu.matmul %0, %1, %cst {dimension_numbers = #tpu.dot_dimension_numbers<[1], [0], [0], [1], [0, 0, 1, 1], [], []>} : vector<16x32xf32>, vector<32x96xf32>, vector<16x96xf32> -> vector<16x96xf32>
    %c0_3 = arith.constant 0 : index
    %c0_4 = arith.constant 0 : index
    %3 = vector.load %arg4[%c0_3, %c0_4] : memref<1x96xf32, #tpu.memory_space<vmem>>, vector<1x96xf32>
    %4 = vector.broadcast %3 : vector<1x96xf32> to vector<16x96xf32>
    %5 = arith.addf %2, %4 : vector<16x96xf32>
    %c0_5 = arith.constant 0 : index
    %c0_6 = arith.constant 0 : index
    %6 = vector.load %arg5[%c0_5, %c0_6] : memref<16x96xf32, #tpu.memory_space<vmem>>, vector<16x96xf32>
    tpu.vector_store %arg5[%c0_5, %c0_6], %5 {strides = array<i32>} : memref<16x96xf32, #tpu.memory_space<vmem>>, vector<16x96xf32>,
    return
  }
  func.func @transform_0(%arg0: i32, %arg1: i32) -> (i32, i32) {
    %c0_i32 = arith.constant 0 : i32
    %c0_i32_0 = arith.constant 0 : i32
    return %arg0, %c0_i32 : i32, i32
  }
  func.func @transform_1(%arg0: i32, %arg1: i32) -> (i32, i32) {
    %c0_i32 = arith.constant 0 : i32
    %c0_i32_0 = arith.constant 0 : i32
    return %c0_i32, %arg1 : i32, i32
  }
  func.func @transform_2(%arg0: i32, %arg1: i32) -> (i32, i32) {
    %c0_i32 = arith.constant 0 : i32
    %c0_i32_0 = arith.constant 0 : i32
    return %c0_i32, %arg1 : i32, i32
  }
  func.func @transform_3(%arg0: i32, %arg1: i32) -> (i32, i32) {
    %c0_i32 = arith.constant 0 : i32
    return %arg0, %arg1 : i32, i32
  }
}

</mosaic_0001>

<bundles_post_ra>
// kernel: tpu_custom_call.1
= control target key start
LH: loop header
LB: loop body
LE: loop exit
PB: predicated region body
PF: predicated region fallthrough
CT: control target
= control target key end

     0   :  { %8 = vsyncpa [#allocation3], 0  ;;  %s337_s0 = inlined_call_operand.hbm [shape: f32[16,32], index: 0, kind: input, shape index: {}]   ;;  %s338_s1 = inlined_call_operand.hbm [shape: f32[32,96], index: 1, kind: input, shape index: {}]   ;;  %s339_s2 = inlined_call_operand.vmem [shape: f32[1,96], index: 2, kind: input, shape index: {}]   ;;  %s340_s3 = inlined_call_operand.hbm [shape: f32[16,96], index: 3, kind: output, shape index: {}]  }
   0x1   :  { %9 = vsyncpa [#allocation6], 0 }
   0x2   :  { %10 = vsyncpa [#allocation4], 0  ;;  %s264_s12 = smov [#allocation2]   ;;  %s192_s16 = scalar_lea.hbm %s337_s0, 256 }
   0x3   :  { %s16_s13 = sshll.u32 %s264_s12, 4  ;;  %p193_p0 = scmp.ne.s32.totalorder %s337_s0, %s192_s16  ;;  %s17_s13 = int_to_ptr.vmem [resolvable:$true] %s16_s13 }
   0x4   :  { %p196_p1 = scmp.lt.u32.totalorder %s192_s16, %s337_s0 }
   0x6   :  { %p198_p2 = pnand %p196_p1, %p193_p0 }
   0x8   :  { %201 = shalt.err (!%p198_p2)
}
   0x9   :  { %s202_s21 = scalar_lea.vmem %s17_s13, 256  ;;  %p207_p4 = scmp.lt.s32.totalorder %s17_s13, %s17_s13 }
   0xa   :  { %p203_p3 = scmp.ne.s32.totalorder %s17_s13, %s202_s21  ;;  %p208_p5 = scmp.lt.s32.totalorder %s202_s21, %s202_s21 }
   0xc   :  { %p209_p6 = por %p208_p5, %p207_p4 }
   0xe   :  { %p210_p7 = pnand %p209_p6, %p203_p3 }
  0x10   :  { %213 = shalt.err (!%p210_p7)
}
  0x11   :  { %s265_s22 = smov 128   ;;  %s266_s23 = smov 8  }
  0x12   :  { %22 = dma.hbm_to_vmem [thread:$0]  %s337_s0, 256, %s17_s13, [#allocation3], %s265_s22, %s265_s22, %s266_s23  }
  0x13   :  { %s267_s26 = smov [#allocation5]   ;;  %s214_s30 = scalar_lea.hbm %s338_s1, 512 }
  0x14   :  { %s28_s27 = sshll.u32 %s267_s26, 4  ;;  %p215_p8 = scmp.ne.s32.totalorder %s338_s1, %s214_s30  ;;  %s29_s27 = int_to_ptr.vmem [resolvable:$true] %s28_s27 }
  0x15   :  { %p218_p9 = scmp.lt.u32.totalorder %s214_s30, %s338_s1 }
  0x17   :  { %p220_p10 = pnand %p218_p9, %p215_p8 }
  0x19   :  { %223 = shalt.err (!%p220_p10)
}
  0x1a   :  { %s224_s8 = scalar_lea.vmem %s29_s27, 512  ;;  %p229_p12 = scmp.lt.s32.totalorder %s29_s27, %s29_s27 }
  0x1b   :  { %p225_p11 = scmp.ne.s32.totalorder %s29_s27, %s224_s8  ;;  %p230_p13 = scmp.lt.s32.totalorder %s224_s8, %s224_s8 }
  0x1d   :  { %p231_p0 = por %p230_p13, %p229_p12 }
  0x1f   :  { %p232_p1 = pnand %p231_p0, %p225_p11 }
  0x21   :  { %235 = shalt.err (!%p232_p1)
}
  0x22   :  { %34 = dma.hbm_to_vmem [thread:$0]  %s338_s1, 512, %s29_s27, [#allocation6], %s265_s22, %s265_s22, %s266_s23  }
  0x23   :  { %258 = dma.done.wait [#allocation3], 256  }
  0x24   :  { %259 = vsyncadd [#allocation3], 4294967040 }
  0x25   :  { %260 = dma.done.wait [#allocation6], 512  }
  0x26   :  { %261 = vsyncadd [#allocation6], 4294966784  ;;  %vm56_vm0 = vcmask 261120   ;;  %v45_v0 = vld [vmem:[#allocation5] sm:$0xff]  ;;  %v46_v1 = vld [vmem:[#allocation5 + $0x8] sm:$0xff]  ;;  %s268_s11 = smov [#allocation7]  }
  0x27   :  { %v47_v2 = vld [vmem:[#allocation5 + $0x10] sm:$0xff]  ;;  %v179_v3 = vpack.c.bf16 %v46_v1, %v45_v0  ;;  %v48_v4 = vld [vmem:[#allocation5 + $0x18] sm:$0xff]  ;;  %s146_s12 = sshll.u32 %s268_s11, 4  ;;  %vm138_vm1 = vcmask 785408   ;;  %s147_s12 = int_to_ptr.vmem [resolvable:$true] %s146_s12 }
  0x28   :  { %v43_v5 = vld [vmem:[#allocation2] sm:$0xff]  ;;  %v183_v6 = vpack.c.bf16 %v48_v4, %v47_v2  ;;  %v44_v7 = vld [vmem:[#allocation2 + $0x8] sm:$0xff]  ;;  %s236_s13 = scalar_lea.vmem %s147_s12, 256  ;;  %p241_p3 = scmp.lt.s32.totalorder %s147_s12, %s147_s12 }
  0x29   :  { %176 = vmatprep.mubr.msk.f32.mxu0 %vm56_vm0, %v43_v5  ;;  %180 = vmatprep.subr.bf16.mxu0 %v179_v3  ;;  %v159_v8 = vld [vmem:[%s339_s2] ss:$0 sm:$0xff]  ;;  %p237_p2 = scmp.ne.s32.totalorder %s147_s12, %s236_s13  ;;  %p242_p4 = scmp.lt.s32.totalorder %s236_s13, %s236_s13 }
  0x2a   :  { %182 = vmatpush3.bf16.msra.mxu0 %v179_v3 }
  0x2b   :  { %184 = vmatprep.subr.bf16.mxu0 %v183_v6  ;;  %p243_p5 = por %p242_p4, %p241_p3 }
  0x2d   :  { %p244_p6 = pnand %p243_p5, %p237_p2 }
  0x2e   :  { %186 = vmatpush3.bf16.msra.mxu0 %v183_v6 }
  0x31   :  { %177 = vmatmul.mubr.msk.f32.vlgmr.msra.gmra.mrb[0].mxu0 %vm56_vm0, %v44_v7 }
 0x104   :  { %v178_v9 = vpop.f32.mrb[0].mxu0 }
 0x105   :  { %v135_v10 = vadd.f32 %v178_v9, %v159_v8  ;;  %v129_v11 = vpop.f32.mrb[1].mxu0 }
 0x106   :  { %v130_v12 = vadd.f32 %v159_v8, %v129_v11 }
 0x107   :  { %140 = vst.msk [vmem:[#allocation7 + $0x8] sm:$0xff] %vm138_vm1, %v135_v10 }
 0x108   :  { %139 = vst.msk [vmem:[#allocation7] sm:$0xff] %vm138_vm1, %v130_v12 }
 0x109   :  { %247 = shalt.err (!%p244_p6)
}
 0x10a   :  { %s248_s2 = scalar_lea.hbm %s340_s3, 256 }
 0x10b   :  { %p249_p7 = scmp.ne.s32.totalorder %s340_s3, %s248_s2  ;;  %p252_p8 = scmp.lt.u32.totalorder %s248_s2, %s340_s3 }
 0x10d   :  { %p254_p9 = pnand %p252_p8, %p249_p7 }
 0x10f   :  { %257 = shalt.err (!%p254_p9)
}
 0x110   :  { %152 = dma.vmem_to_hbm [thread:$0]  %s147_s12, 256, %s340_s3, [#allocation4], %s265_s22, %s265_s22, %s266_s23  }
 0x111   :  { %262 = dma.done.wait [#allocation4], 256  }
 0x112   :  { %263 = vsyncadd [#allocation4], 4294967040 }
 0x113   :  { %156 = vsyncpa [#allocation3], 1 }
 0x114   :  { %157 = vsyncpa [#allocation6], 1 }
 0x115   :  { %158 = vsyncpa [#allocation4], 1 }

</bundles_post_ra>
